<compile_context>
chip_gen: v7x
topology: tpu7x:2x2x1
jax: 0.10.0
libtpu: 0.0.40
codegen_flags: <defaults>
</compile_context>

<pallas_src>
import functools

import jax
import jax.numpy as jnp
from jax.experimental import pallas as pl
from jax.experimental.pallas import tpu as pltpu


def rgb_head_kernel(x_ref, w_ref, b_ref, o_ref, acc_ref, *, inv_s):
    # x_ref:   [tn, C, ts]   input tile (channels on sublane, spatial on lane)
    # w_ref:   [C, Kp]       fc_cls weight (transposed, class-padded)
    # b_ref:   [1, Kp]       fc_cls bias (class-padded)
    # o_ref:   [tn, Kp]      class-score tile
    # acc_ref: [tn, C] f32   running spatial sum, resident across the S axis
    s_idx = pl.program_id(1)

    @pl.when(s_idx == 0)
    def _():
        acc_ref[...] = jnp.zeros_like(acc_ref)

    # Partial global-average-pool: sum this S tile over the lane axis (XLU).
    acc_ref[...] += jnp.sum(x_ref[...].astype(jnp.float32), axis=-1)

    @pl.when(s_idx == pl.num_programs(1) - 1)
    def _():
        pooled = acc_ref[...] * inv_s  # mean over the true (unpadded) S
        # dropout == identity (eval mode)
        o_ref[...] = (
            jnp.dot(pooled, w_ref[...], preferred_element_type=jnp.float32)
            + b_ref[...]
        ).astype(o_ref.dtype)


def _pick_s_tile(s, row_bytes, budget):
    """Largest S tile that exactly divides S, is a multiple of 128 (or is the
    full S), and keeps a single x block under `budget` bytes."""
    if s * row_bytes <= budget:
        return s
    best = None
    ts = 128
    while ts < s:
        if s % ts == 0 and ts * row_bytes <= budget:
            best = ts
        ts += 128
    return best if best is not None else s


def rgb_head_forward(x_ncdhw, weight, bias):
    """x_ncdhw: [N, C, T, H, W]; weight: [K, C] (torch layout); bias: [K]."""
    n, c, t, h, w = x_ncdhw.shape
    k = weight.shape[0]
    s = t * h * w
    itemsize = jnp.dtype(x_ncdhw.dtype).itemsize

    # Free, contiguous reshape: channels stay on the sublane axis, the pooled
    # (T, H, W) axis lands on the lane axis for the in-kernel reduce.
    x_ncs = x_ncdhw.reshape(n, c, s)

    # Pad classes to a lane-dense multiple of 128 (zero columns -> exact result).
    kp = max(128, ((k + 127) // 128) * 128)
    w_ck = jnp.zeros((c, kp), dtype=jnp.float32).at[:, :k].set(
        jnp.transpose(weight, (1, 0)).astype(jnp.float32)
    )
    b_1k = jnp.zeros((1, kp), dtype=jnp.float32).at[:, :k].set(
        bias.astype(jnp.float32).reshape(1, k)
    )

    # --- tile selection -----------------------------------------------------
    tn = n if n <= 8 else 8
    try:
        vmem_cap = pltpu.get_tpu_info().vmem_capacity_bytes
    except Exception:  # conservative fallback (v7x-sized)
        vmem_cap = 64 * 1024 * 1024
    # Per-block x budget; Pallas double-buffers, so keep generous headroom.
    x_block_budget = min(8 * 1024 * 1024, vmem_cap // 8)
    ts = _pick_s_tile(s, tn * c * itemsize, x_block_budget)

    grid = (pl.cdiv(n, tn), pl.cdiv(s, ts))

    x_block_bytes = tn * c * ts * itemsize
    vmem_limit = int(
        min(
            vmem_cap,
            max(
                2 * x_block_bytes
                + 2 * (c * kp + kp + tn * kp) * 4
                + tn * c * 4
                + (4 << 20),
                16 << 20,
            ),
        )
    )

    cost = pl.CostEstimate(
        flops=n * c * s + 2 * n * c * kp,
        transcendentals=0,
        bytes_accessed=n * c * s * itemsize + (c * kp + kp + n * kp) * 4,
    )

    out = pl.pallas_call(
        functools.partial(rgb_head_kernel, inv_s=1.0 / float(s)),
        out_shape=jax.ShapeDtypeStruct((n, kp), jnp.float32),
        grid_spec=pltpu.PrefetchScalarGridSpec(
            num_scalar_prefetch=0,
            grid=grid,
            in_specs=[
                pl.BlockSpec((tn, c, ts), lambda ni, si: (ni, 0, si)),
                pl.BlockSpec((c, kp), lambda ni, si: (0, 0)),
                pl.BlockSpec((1, kp), lambda ni, si: (0, 0)),
            ],
            out_specs=pl.BlockSpec((tn, kp), lambda ni, si: (ni, 0)),
            scratch_shapes=[pltpu.VMEM((tn, c), jnp.float32)],
        ),
        compiler_params=pltpu.CompilerParams(
            dimension_semantics=("parallel", "arbitrary"),
            vmem_limit_bytes=vmem_limit,
        ),
        cost_estimate=cost,
    )(x_ncs, w_ck, b_1k)

    return out[:, :k]


if __name__ == "__main__":
    # Small shapes consistent with a CSN feature map.
    N, C, T, H, W = 2, 32, 2, 4, 4
    NUM_CLASSES = 8
    INIT_STD = 0.01

    key = jax.random.PRNGKey(0)
    kx, kw = jax.random.split(key)

    x = jax.random.normal(kx, (N, C, T, H, W), dtype=jnp.float32)

    # Deterministic parameter init mirroring RGBHead.init_weights():
    # fc_cls.weight ~ Normal(0, init_std), fc_cls.bias = 0.
    fc_weight = INIT_STD * jax.random.normal(
        kw, (NUM_CLASSES, C), dtype=jnp.float32
    )
    fc_bias = jnp.zeros((NUM_CLASSES,), dtype=jnp.float32)

    out = rgb_head_forward(x, fc_weight, fc_bias)
    out = jax.block_until_ready(out)

    # Reference check in plain JAX.
    pooled_ref = jnp.mean(x, axis=(2, 3, 4))  # [N, C]
    ref = pooled_ref @ fc_weight.T + fc_bias
    assert out.shape == (N, NUM_CLASSES)
    assert jnp.allclose(out, ref, atol=1e-5, rtol=1e-5), "mismatch vs reference"

    print("KERNEL_OK")
</pallas_src>

<mosaic_0001>
module attributes {stable_mosaic.version = 11 : i64} {
  func.func @rgb_head_kernel(%arg0: i32, %arg1: i32, %arg2: memref<2x32x32xf32, #tpu.memory_space<vmem>>, %arg3: memref<32x128xf32, #tpu.memory_space<vmem>>, %arg4: memref<1x128xf32, #tpu.memory_space<vmem>>, %arg5: memref<2x128xf32, #tpu.memory_space<vmem>>, %arg6: memref<2x32xf32, #tpu.memory_space<vmem>>) attributes {dimension_semantics = [#tpu.dimension_semantics<parallel>, #tpu.dimension_semantics<arbitrary>], iteration_bounds = array<i64: 1, 1>, scalar_prefetch = 0 : i64, scratch_operands = 1 : i64, tpu.core_type = #tpu.core_type<tc>, window_params = [{transform_indices = @transform_0, window_bounds = array<i64: 2, 32, 32>}, {pipeline_mode = #tpu.pipeline_mode<synchronous>, transform_indices = @transform_1, window_bounds = array<i64: 32, 128>}, {pipeline_mode = #tpu.pipeline_mode<synchronous>, transform_indices = @transform_2, window_bounds = array<i64: 1, 128>}, {transform_indices = @transform_3, window_bounds = array<i64: 2, 128>}]} {
    %c0_i32 = arith.constant 0 : i32
    %0 = arith.cmpi eq, %arg1, %c0_i32 : i32
    %1 = arith.extui %0 : i1 to i32
    %c0_i32_0 = arith.constant 0 : i32
    %2 = arith.cmpi ne, %1, %c0_i32_0 : i32
    scf.if %2 {
      %cst_9 = arith.constant 0.000000e+00 : f32
      %11 = vector.broadcast %cst_9 : f32 to vector<2x32xf32>
      %c0_10 = arith.constant 0 : index
      %c0_11 = arith.constant 0 : index
      %12 = vector.load %arg6[%c0_10, %c0_11] : memref<2x32xf32, #tpu.memory_space<vmem>>, vector<2x32xf32>
      tpu.vector_store %arg6[%c0_10, %c0_11], %11 {strides = array<i32>} : memref<2x32xf32, #tpu.memory_space<vmem>>, vector<2x32xf32>,
    } else {
    }
    %c0 = arith.constant 0 : index
    %c0_1 = arith.constant 0 : index
    %3 = vector.load %arg6[%c0, %c0_1] : memref<2x32xf32, #tpu.memory_space<vmem>>, vector<2x32xf32>
    %c0_2 = arith.constant 0 : index
    %c0_3 = arith.constant 0 : index
    %c0_4 = arith.constant 0 : index
    %4 = vector.load %arg2[%c0_2, %c0_3, %c0_4] : memref<2x32x32xf32, #tpu.memory_space<vmem>>, vector<2x32x32xf32>
    %cst = arith.constant dense<0.000000e+00> : vector<2x32xf32>
    %5 = vector.multi_reduction <add>, %4, %cst [2] : vector<2x32x32xf32> to vector<2x32xf32>
    %6 = arith.addf %3, %5 : vector<2x32xf32>
    %c0_5 = arith.constant 0 : index
    %c0_6 = arith.constant 0 : index
    %7 = vector.load %arg6[%c0_5, %c0_6] : memref<2x32xf32, #tpu.memory_space<vmem>>, vector<2x32xf32>
    tpu.vector_store %arg6[%c0_5, %c0_6], %6 {strides = array<i32>} : memref<2x32xf32, #tpu.memory_space<vmem>>, vector<2x32xf32>,
    %c0_i32_7 = arith.constant 0 : i32
    %8 = arith.cmpi eq, %arg1, %c0_i32_7 : i32
    %9 = arith.extui %8 : i1 to i32
    %c0_i32_8 = arith.constant 0 : i32
    %10 = arith.cmpi ne, %9, %c0_i32_8 : i32
    scf.if %10 {
      %c0_9 = arith.constant 0 : index
      %c0_10 = arith.constant 0 : index
      %11 = vector.load %arg6[%c0_9, %c0_10] : memref<2x32xf32, #tpu.memory_space<vmem>>, vector<2x32xf32>
      %cst_11 = arith.constant 3.125000e-02 : f32
      %12 = vector.broadcast %cst_11 : f32 to vector<2x32xf32>
      %13 = arith.mulf %11, %12 : vector<2x32xf32>
      %c0_12 = arith.constant 0 : index
      %c0_13 = arith.constant 0 : index
      %14 = vector.load %arg3[%c0_12, %c0_13] : memref<32x128xf32, #tpu.memory_space<vmem>>, vector<32x128xf32>
      %cst_14 = arith.constant dense<0.000000e+00> : vector<2x128xf32>
      %15 = tpu.matmul %13, %14, %cst_14 {dimension_numbers = #tpu.dot_dimension_numbers<[1], [0], [0], [1], [0, 0, 1, 1], [], []>} : vector<2x32xf32>, vector<32x128xf32>, vector<2x128xf32> -> vector<2x128xf32>
      %c0_15 = arith.constant 0 : index
      %c0_16 = arith.constant 0 : index
      %16 = vector.load %arg4[%c0_15, %c0_16] : memref<1x128xf32, #tpu.memory_space<vmem>>, vector<1x128xf32>
      %17 = vector.broadcast %16 : vector<1x128xf32> to vector<2x128xf32>
      %18 = arith.addf %15, %17 : vector<2x128xf32>
      %c0_17 = arith.constant 0 : index
      %c0_18 = arith.constant 0 : index
      %19 = vector.load %arg5[%c0_17, %c0_18] : memref<2x128xf32, #tpu.memory_space<vmem>>, vector<2x128xf32>
      tpu.vector_store %arg5[%c0_17, %c0_18], %18 {strides = array<i32>} : memref<2x128xf32, #tpu.memory_space<vmem>>, vector<2x128xf32>,
    } else {
    }
    return
  }
  func.func @transform_0(%arg0: i32, %arg1: i32) -> (i32, i32, i32) {
    %c0_i32 = arith.constant 0 : i32
    %c0_i32_0 = arith.constant 0 : i32
    return %arg0, %c0_i32, %arg1 : i32, i32, i32
  }
  func.func @transform_1(%arg0: i32, %arg1: i32) -> (i32, i32) {
    %c0_i32 = arith.constant 0 : i32
    %c0_i32_0 = arith.constant 0 : i32
    %c0_i32_1 = arith.constant 0 : i32
    return %c0_i32, %c0_i32_0 : i32, i32
  }
  func.func @transform_2(%arg0: i32, %arg1: i32) -> (i32, i32) {
    %c0_i32 = arith.constant 0 : i32
    %c0_i32_0 = arith.constant 0 : i32
    %c0_i32_1 = arith.constant 0 : i32
    return %c0_i32, %c0_i32_0 : i32, i32
  }
  func.func @transform_3(%arg0: i32, %arg1: i32) -> (i32, i32) {
    %c0_i32 = arith.constant 0 : i32
    %c0_i32_0 = arith.constant 0 : i32
    return %arg0, %c0_i32 : i32, i32
  }
}

</mosaic_0001>

<bundles_post_ra>
// kernel: tpu_custom_call.1
= control target key start
LH: loop header
LB: loop body
LE: loop exit
PB: predicated region body
PF: predicated region fallthrough
CT: control target
= control target key end

     0   :  { %8 = vsyncpa [#allocation4], 0  ;;  %s431_s0 = inlined_call_operand.hbm [shape: f32[2,32,32], index: 0, kind: input, shape index: {}]   ;;  %s432_s1 = inlined_call_operand.hbm [shape: f32[32,128], index: 1, kind: input, shape index: {}]   ;;  %s433_s2 = inlined_call_operand.vmem [shape: f32[1,128], index: 2, kind: input, shape index: {}]   ;;  %s434_s3 = inlined_call_operand.hbm [shape: f32[2,128], index: 3, kind: output, shape index: {}]  }
   0x1   :  { %9 = vsyncpa [#allocation7], 0 }
   0x2   :  { %10 = vsyncpa [#allocation5], 0  ;;  %s353_s12 = smov [#allocation3]   ;;  %s281_s16 = scalar_lea.hbm %s431_s0, 1024 }
   0x3   :  { %s16_s13 = sshll.u32 %s353_s12, 4  ;;  %p282_p0 = scmp.ne.s32.totalorder %s431_s0, %s281_s16  ;;  %s17_s13 = int_to_ptr.vmem [resolvable:$true] %s16_s13 }
   0x4   :  { %p285_p1 = scmp.lt.u32.totalorder %s281_s16, %s431_s0 }
   0x6   :  { %p287_p2 = pnand %p285_p1, %p282_p0 }
   0x8   :  { %290 = shalt.err (!%p287_p2)
}
   0x9   :  { %s291_s21 = scalar_lea.vmem %s17_s13, 1024  ;;  %p296_p4 = scmp.lt.s32.totalorder %s17_s13, %s17_s13 }
   0xa   :  { %p292_p3 = scmp.ne.s32.totalorder %s17_s13, %s291_s21  ;;  %p297_p5 = scmp.lt.s32.totalorder %s291_s21, %s291_s21 }
   0xc   :  { %p298_p6 = por %p297_p5, %p296_p4 }
   0xe   :  { %p299_p7 = pnand %p298_p6, %p292_p3 }
  0x10   :  { %302 = shalt.err (!%p299_p7)
}
  0x11   :  { %s354_s22 = smov 128   ;;  %s355_s23 = smov 8  }
  0x12   :  { %22 = dma.hbm_to_vmem [thread:$0]  %s431_s0, 1024, %s17_s13, [#allocation4], %s354_s22, %s354_s22, %s355_s23  }
  0x13   :  { %s356_s26 = smov [#allocation6]   ;;  %s303_s30 = scalar_lea.hbm %s432_s1, 512 }
  0x14   :  { %s28_s27 = sshll.u32 %s356_s26, 4  ;;  %p304_p8 = scmp.ne.s32.totalorder %s432_s1, %s303_s30  ;;  %s29_s27 = int_to_ptr.vmem [resolvable:$true] %s28_s27 }
  0x15   :  { %p307_p9 = scmp.lt.u32.totalorder %s303_s30, %s432_s1 }
  0x17   :  { %p309_p10 = pnand %p307_p9, %p304_p8 }
  0x19   :  { %312 = shalt.err (!%p309_p10)
}
  0x1a   :  { %s313_s8 = scalar_lea.vmem %s29_s27, 512  ;;  %p318_p12 = scmp.lt.s32.totalorder %s29_s27, %s29_s27 }
  0x1b   :  { %p314_p11 = scmp.ne.s32.totalorder %s29_s27, %s313_s8  ;;  %p319_p13 = scmp.lt.s32.totalorder %s313_s8, %s313_s8 }
  0x1d   :  { %p320_p0 = por %p319_p13, %p318_p12 }
  0x1f   :  { %p321_p1 = pnand %p320_p0, %p314_p11 }
  0x21   :  { %324 = shalt.err (!%p321_p1)
}
  0x22   :  { %34 = dma.hbm_to_vmem [thread:$0]  %s432_s1, 512, %s29_s27, [#allocation7], %s354_s22, %s354_s22, %s355_s23  }
  0x23   :  { %347 = dma.done.wait [#allocation4], 1024  }
  0x24   :  { %348 = vsyncadd [#allocation4], 4294966272 }
  0x25   :  { %349 = dma.done.wait [#allocation7], 512  }
  0x26   :  { %350 = vsyncadd [#allocation7], 4294966784  ;;  %vm58_vm0 = vcmask 261120   ;;  %v54_v0 = vld [vmem:[#allocation3 + $0x20] sm:$0xff]  ;;  %v55_v2 = vld [vmem:[#allocation3 + $0x28] sm:$0xff]  ;;  %vm47_vm1 = vcmask 254976   ;;  %v91_v24 = vlaneseq }
  0x27   :  { %v50_v1 = vld [vmem:[#allocation3] sm:$0xff]  ;;  %v71_v3 = vsel %vm58_vm0, %v54_v0, 0.0  ;;  %v51_v5 = vld [vmem:[#allocation3 + $0x8] sm:$0xff]  ;;  %v74_v6 = vsel %vm58_vm0, %v55_v2, 0.0  ;;  %v56_v8 = vld [vmem:[#allocation3 + $0x30] sm:$0xff]  ;;  %v357_v16 = vmov 0.0  }
  0x28   :  { %v59_v4 = vsel %vm58_vm0, %v50_v1, 0.0  ;;  %72 = vadd.xlane.f32.xlu1 %v71_v3  ;;  %v62_v7 = vsel %vm58_vm0, %v51_v5, 0.0  ;;  %v52_v9 = vld [vmem:[#allocation3 + $0x10] sm:$0xff]  ;;  %v77_v10 = vsel %vm58_vm0, %v56_v8, 0.0  ;;  %v57_v12 = vld [vmem:[#allocation3 + $0x38] sm:$0xff]  ;;  %v148_v17 = vld [vmem:[#allocation6] sm:$0xff] }
  0x29   :  { %60 = vadd.xlane.f32.xlu0 %v59_v4  ;;  %v65_v11 = vsel %vm58_vm0, %v52_v9, 0.0  ;;  %v53_v13 = vld [vmem:[#allocation3 + $0x18] sm:$0xff]  ;;  %v80_v14 = vsel %vm58_vm0, %v57_v12, 0.0  ;;  %48 = vst.msk [vmem:[#allocation2] sm:$0x3] %vm47_vm1, %v357_v16  ;;  %v149_v18 = vld [vmem:[#allocation6 + $0x8] sm:$0xff] }
  0x2a   :  { %v68_v15 = vsel %vm58_vm0, %v53_v13, 0.0  ;;  %v150_v19 = vld [vmem:[#allocation6 + $0x10] sm:$0xff]  ;;  %v358_v20 = vmov 0.0|0.0   ;;  %v268_v21 = vpack.c.bf16 %v149_v18, %v148_v17  ;;  %v151_v22 = vld [vmem:[#allocation6 + $0x18] sm:$0xff]  ;;  %vm359_vm2 = vmmov 0   ;;  %s360_s11 = smov [#allocation8]  }
  0x2b   :  { %267 = vmatprep.subr.bf16.mxu0 %v358_v20  ;;  %v271_v23 = vpack.c.bf16 %v151_v22, %v150_v19  ;;  %264 = vmatprep.mubr.msk.f32.mxu0 %vm359_vm2, %v357_v16  ;;  %v92_v25 = vand.u32 127, %v91_v24  ;;  %v94_v30 = vshrl.u32 %v91_v24, 7  ;;  %vm102_vm3 = vcmask 130112   ;;  %v249_v61 = vld [vmem:[%s433_s2] ss:$0 sm:$0xff]  ;;  %s239_s12 = sshll.u32 %s360_s11, 4  ;;  %s240_s12 = int_to_ptr.vmem [resolvable:$true] %s239_s12 }
  0x2c   :  { %75 = vadd.xlane.f32.xlu1 %v74_v6  ;;  %269 = vmatpush3.bf16.msra.mxu0 %v268_v21  ;;  %vm109_vm4 = vcmask 195712   ;;  %vm116_vm5 = vcmask 261312   ;;  %vm137_vm6 = vcmask 1041409   ;;  %s325_s13 = scalar_lea.vmem %s240_s12, 32  ;;  %p330_p3 = scmp.lt.s32.totalorder %s240_s12, %s240_s12 }
  0x2d   :  { %63 = vadd.xlane.f32.xlu0 %v62_v7  ;;  %270 = vmatprep.subr.bf16.mxu0 %v358_v20  ;;  %v97_v28 = vadd.s32 4294967288, %v92_v25  ;;  %v104_v29 = vadd.s32 4294967280, %v92_v25  ;;  %v111_v34 = vadd.s32 4294967272, %v92_v25  ;;  %v95_v36 = vsub.s32 %v92_v25, %v94_v30  ;;  %p326_p2 = scmp.ne.s32.totalorder %s240_s12, %s325_s13  ;;  %p331_p4 = scmp.lt.s32.totalorder %s325_s13, %s325_s13 }
  0x2f   :  { %v100_v33 = vsub.s32 %v97_v28, %v94_v30  ;;  %v107_v35 = vsub.s32 %v104_v29, %v94_v30  ;;  %v114_v41 = vsub.s32 %v111_v34, %v94_v30  ;;  %p332_p5 = por %p331_p4, %p330_p3 }
  0x30   :  { %78 = vadd.xlane.f32.xlu1 %v77_v10  ;;  %272 = vmatpush3.bf16.msra.mxu0 %v271_v23  ;;  %v49_v54 = vld [vmem:[#allocation2] sm:$0x3] }
  0x31   :  { %66 = vadd.xlane.f32.xlu0 %v65_v11  ;;  %p333_p6 = pnand %p332_p5, %p326_p2 }
  0x34   :  { %81 = vadd.xlane.f32.xlu1 %v80_v14 }
  0x35   :  { %69 = vadd.xlane.f32.xlu0 %v68_v15 }
  0xb5   :  { %v73_v26 = vpop.xlane.xlu1 %72 }
  0xb6   :  { %v61_v27 = vpop.xlane.xlu0 %60  ;;  %v121_v44 = vrot.slane %v73_v26, %v95_v36 }
  0xb7   :  { %v96_v45 = vrot.slane %v61_v27, %v95_v36 }
  0xb9   :  { %v76_v31 = vpop.xlane.xlu1 %75 }
  0xba   :  { %v64_v32 = vpop.xlane.xlu0 %63  ;;  %v125_v39 = vrot.slane %v76_v31, %v100_v33 }
  0xbb   :  { %v101_v40 = vrot.slane %v64_v32, %v100_v33 }
  0xbc   :  { %v126_v48 = vsel %vm102_vm3, %v125_v39, %v121_v44 }
  0xbd   :  { %v79_v37 = vpop.xlane.xlu1 %78  ;;  %v103_v49 = vsel %vm102_vm3, %v101_v40, %v96_v45 }
  0xbe   :  { %v67_v38 = vpop.xlane.xlu0 %66  ;;  %v130_v42 = vrot.slane %v79_v37, %v107_v35 }
  0xbf   :  { %v108_v43 = vrot.slane %v67_v38, %v107_v35 }
  0xc0   :  { %v131_v52 = vsel %vm109_vm4, %v130_v42, %v126_v48 }
  0xc1   :  { %v82_v46 = vpop.xlane.xlu1 %81  ;;  %v110_v53 = vsel %vm109_vm4, %v108_v43, %v103_v49 }
  0xc2   :  { %v70_v47 = vpop.xlane.xlu0 %69  ;;  %v135_v50 = vrot.slane %v82_v46, %v114_v41 }
  0xc3   :  { %v115_v51 = vrot.slane %v70_v47, %v114_v41 }
  0xc4   :  { %v136_v55 = vsel %vm116_vm5, %v135_v50, %v131_v52 }
  0xc5   :  { %v117_v56 = vsel %vm116_vm5, %v115_v51, %v110_v53 }
  0xc6   :  { %v138_v57 = vsel %vm137_vm6, %v136_v55, %v117_v56 }
  0xc7   :  { %v140_v58 = vadd.f32 %v138_v57, %v49_v54 }
  0xc9   :  { %142 = vst.msk [vmem:[#allocation2] sm:$0x3] %vm47_vm1, %v140_v58 }
  0xd0   :  { %v146_v59 = vld [vmem:[#allocation2] sm:$0x3] }
  0xd1   :  { %v147_v60 = vmul.f32 0.03125, %v146_v59 }
  0xd3   :  { %265 = vmatmul.mubr.msk.f32.vlgmr.msra.gmra.mrb[0].mxu0 %vm58_vm0, %v147_v60 }
 0x1a6   :  { %v228_v62 = vpop.f32.mrb[0].mxu0 }
 0x1a7   :  { %v229_v63 = vadd.f32 %v249_v61, %v228_v62  ;;  %v266_v0 = vpop.f32.mrb[1].mxu0 }
 0x1a9   :  { %232 = vst [vmem:[#allocation8] sm:$0x3] %v229_v63 }
 0x1aa   :  { %336 = shalt.err (!%p333_p6)
}
 0x1ab   :  { %s337_s16 = scalar_lea.hbm %s434_s3, 32 }
 0x1ac   :  { %p338_p7 = scmp.ne.s32.totalorder %s434_s3, %s337_s16  ;;  %p341_p8 = scmp.lt.u32.totalorder %s337_s16, %s434_s3 }
 0x1ae   :  { %p343_p9 = pnand %p341_p8, %p338_p7 }
 0x1b0   :  { %346 = shalt.err (!%p343_p9)
}
 0x1b1   :  { %242 = dma.vmem_to_hbm [thread:$0]  %s240_s12, 32, %s434_s3, [#allocation5]  }
 0x1b2   :  { %351 = dma.done.wait [#allocation5], 32  }
 0x1b3   :  { %352 = vsyncadd [#allocation5], 4294967264 }
 0x1b4   :  { %246 = vsyncpa [#allocation4], 1 }
 0x1b5   :  { %247 = vsyncpa [#allocation7], 1 }
 0x1b6   :  { %248 = vsyncpa [#allocation5], 1 }

</bundles_post_ra>
